<compile_context>
chip_gen: v7x
topology: tpu7x:2x2x1
jax: 0.10.0
libtpu: 0.0.40
codegen_flags: <defaults>
</compile_context>

<pallas_src>
import jax
import jax.numpy as jnp
from jax.experimental import pallas as pl
from jax.experimental.pallas import tpu as pltpu

_GELU_C = 0.7978845608028654  # sqrt(2 / pi)


def _round_up(a, b):
    return (a + b - 1) // b * b


def _gelu_tanh_f32(h):
    # Matches nn.GELU(approximate='tanh'), computed in f32.
    return 0.5 * h * (1.0 + jnp.tanh(_GELU_C * (h + 0.044715 * h * h * h)))


def _vmem_budget_bytes():
    """~80% of physical VMEM: ~102 MiB on 128 MiB chips, ~51 MiB on v7x (64 MiB/TC)."""
    phys = 64 << 20  # conservative floor if query unavailable
    try:
        info = pltpu.get_tpu_info()
        cap = getattr(info, "vmem_capacity_bytes", None)
        if cap:
            phys = int(cap)
    except Exception:
        pass
    return int(phys * 0.8)


# --------------------------------------------------------------------------- #
# Kernels
# --------------------------------------------------------------------------- #
def mlp_kernel_fused(x_ref, wfc_ref, bfc_ref, wproj_ref, bproj_ref, o_ref):
    """th == H: full hidden dim resident, no accumulator scratch.

    x_ref:     (tm, C)   native dtype (bf16/f32)
    wfc_ref:   (C, H)    c_fc weight
    bfc_ref:   (1, H)
    wproj_ref: (H, C)    c_proj weight
    bproj_ref: (1, C)
    o_ref:     (tm, C)
    """
    h = jnp.dot(x_ref[...], wfc_ref[...], preferred_element_type=jnp.float32)
    h = h + bfc_ref[...].astype(jnp.float32)
    h = _gelu_tanh_f32(h)
    # Cast activation back to weight dtype so the H-contraction is a bf16 MXU
    # matmul too; keep f32 accumulation.
    out = jnp.dot(h.astype(wproj_ref.dtype), wproj_ref[...],
                  preferred_element_type=jnp.float32)
    out = out + bproj_ref[...].astype(jnp.float32)
    o_ref[...] = out.astype(o_ref.dtype)


def mlp_kernel_streamed(x_ref, wfc_ref, bfc_ref, wproj_ref, bproj_ref, o_ref,
                        acc_ref):
    """th < H: stream hidden-dim weight slabs, accumulate c_proj partials in f32.

    Grid = (row tile i [parallel], hidden tile j [arbitrary, reduction last]).
    acc_ref: (tm, C) f32 scratch, output block index invariant across j.
    """
    j = pl.program_id(1)

    @pl.when(j == 0)
    def _():
        # Fold b_proj into the accumulator init (saves a (tm,C) add + readback).
        acc_ref[...] = jnp.broadcast_to(
            bproj_ref[...].astype(jnp.float32), acc_ref.shape)

    h = jnp.dot(x_ref[...], wfc_ref[...], preferred_element_type=jnp.float32)
    h = h + bfc_ref[...].astype(jnp.float32)
    h = _gelu_tanh_f32(h)
    acc_ref[...] += jnp.dot(h.astype(wproj_ref.dtype), wproj_ref[...],
                            preferred_element_type=jnp.float32)

    @pl.when(j == pl.num_programs(1) - 1)
    def _():
        o_ref[...] = acc_ref[...].astype(o_ref.dtype)


# --------------------------------------------------------------------------- #
# pallas_call builders
# --------------------------------------------------------------------------- #
def _call_fused(x2, w_fc, b_fc2, w_proj, b_proj2, *, tm, vmem_limit,
                single_buffer):
    M_pad, C = x2.shape
    H = w_fc.shape[1]

    def wspec(shape, imap):
        # Grid-invariant weight/bias tiles: single-buffer to halve residency.
        if single_buffer:
            return pl.BlockSpec(shape, imap, pipeline_mode=pl.Buffered(1))
        return pl.BlockSpec(shape, imap)

    return pl.pallas_call(
        mlp_kernel_fused,
        out_shape=jax.ShapeDtypeStruct((M_pad, C), x2.dtype),
        grid_spec=pltpu.PrefetchScalarGridSpec(
            num_scalar_prefetch=0,
            grid=(M_pad // tm,),
            in_specs=[
                pl.BlockSpec((tm, C), lambda i: (i, 0)),   # x row tile
                wspec((C, H), lambda i: (0, 0)),           # W_fc (resident)
                wspec((1, H), lambda i: (0, 0)),           # b_fc
                wspec((H, C), lambda i: (0, 0)),           # W_proj (resident)
                wspec((1, C), lambda i: (0, 0)),           # b_proj
            ],
            out_specs=pl.BlockSpec((tm, C), lambda i: (i, 0)),
        ),
        compiler_params=pltpu.CompilerParams(
            dimension_semantics=("parallel",),
            vmem_limit_bytes=vmem_limit),
    )(x2, w_fc, b_fc2, w_proj, b_proj2)


def _call_streamed(x2, w_fc, b_fc2, w_proj, b_proj2, *, tm, th, vmem_limit):
    M_pad, C = x2.shape
    H = w_fc.shape[1]

    return pl.pallas_call(
        mlp_kernel_streamed,
        out_shape=jax.ShapeDtypeStruct((M_pad, C), x2.dtype),
        grid_spec=pltpu.PrefetchScalarGridSpec(
            num_scalar_prefetch=0,
            grid=(M_pad // tm, H // th),
            in_specs=[
                pl.BlockSpec((tm, C), lambda i, j: (i, 0)),   # x row tile
                pl.BlockSpec((C, th), lambda i, j: (0, j)),   # W_fc slab
                pl.BlockSpec((1, th), lambda i, j: (0, j)),   # b_fc slab
                pl.BlockSpec((th, C), lambda i, j: (j, 0)),   # W_proj slab
                pl.BlockSpec((1, C), lambda i, j: (0, 0)),    # b_proj
            ],
            out_specs=pl.BlockSpec((tm, C), lambda i, j: (i, 0)),
            scratch_shapes=[pltpu.VMEM((tm, C), jnp.float32)],
        ),
        compiler_params=pltpu.CompilerParams(
            dimension_semantics=("parallel", "arbitrary"),
            vmem_limit_bytes=vmem_limit),
    )(x2, w_fc, b_fc2, w_proj, b_proj2)


# --------------------------------------------------------------------------- #
# Public wrapper
# --------------------------------------------------------------------------- #
def mlp_pallas(x, w_fc, b_fc, w_proj, b_proj, *, tm=None, th=None):
    """GPT-2 MLP forward.  x: (B, T, C); weights in (in, out) layout."""
    B, T, C = x.shape
    Cin, H = w_fc.shape
    assert Cin == C and w_proj.shape == (H, C)
    assert b_fc.shape == (H,) and b_proj.shape == (C,)
    assert x.dtype == w_fc.dtype == w_proj.dtype, (
        "pass x and weights in the same dtype (bf16 recommended on v6e/v7x)")

    M = B * T
    x2 = x.reshape(M, C)

    itemsize = jnp.dtype(x.dtype).itemsize
    # bf16 packs 2 rows/sublane -> 16-row alignment; int8/fp8 -> 32.
    row_align = {4: 8, 2: 16, 1: 32}.get(itemsize, 8)

    # Hidden tile: default keeps full H resident (fastest when weights fit in
    # VMEM); set th (128-aligned, >=256 recommended on v6e/v7x) to stream weight
    # slabs + accumulate when they do not.
    if th is None:
        th = H
    assert H % th == 0, "th must divide H"
    assert th == H or th % 128 == 0, "partial hidden tiles must be 128-aligned"
    streaming = th != H

    # Row tile: 512 default; 1024 when streaming weights (keeps the weight-slab
    # HBM traffic per row tile below the v6e roofline).
    if tm is None:
        tm = 1024 if streaming else 512
    tm = _round_up(min(int(tm), _round_up(M, row_align)), row_align)
    # v7x megacore: make sure the 'parallel' row axis has >= 2 tiles when possible.
    if _round_up(M, tm) // tm < 2 and M >= 2 * row_align:
        tm = _round_up(pl.cdiv(M, 2), row_align)
    M_pad = _round_up(M, tm)
    if M_pad != M:
        x2 = jnp.pad(x2, ((0, M_pad - M), (0, 0)))

    b_fc2 = b_fc.reshape(1, H)
    b_proj2 = b_proj.reshape(1, C)

    wbytes = jnp.dtype(w_fc.dtype).itemsize
    budget = _vmem_budget_bytes()

    def _est(single_buffer_weights):
        wbuf = 1 if (single_buffer_weights and not streaming) else 2
        e = (wbuf * (C * th + th * C + th + C) * wbytes   # weights + biases
             + 2 * 2 * tm * C * itemsize                  # double-buffered x/out
             + tm * th * (4 + wbytes))                    # f32 hidden + cast copy
        if streaming:
            e += tm * C * 4                               # f32 accumulator scratch
        return e

    if not streaming:
        try:
            vmem_limit = int(min(max(2 * _est(True), 32 << 20), budget))
            out2 = _call_fused(x2, w_fc, b_fc2, w_proj, b_proj2, tm=tm,
                               vmem_limit=vmem_limit, single_buffer=True)
        except Exception:
            # Older JAX without BlockSpec(pipeline_mode=...) support.
            vmem_limit = int(min(max(2 * _est(False), 32 << 20), budget))
            out2 = _call_fused(x2, w_fc, b_fc2, w_proj, b_proj2, tm=tm,
                               vmem_limit=vmem_limit, single_buffer=False)
    else:
        vmem_limit = int(min(max(2 * _est(False), 32 << 20), budget))
        out2 = _call_streamed(x2, w_fc, b_fc2, w_proj, b_proj2, tm=tm, th=th,
                              vmem_limit=vmem_limit)

    if M_pad != M:
        out2 = out2[:M]
    return out2.reshape(B, T, C)


def mlp_reference(x, w_fc, b_fc, w_proj, b_proj):
    h = jnp.einsum("btc,ch->bth", x, w_fc) + b_fc
    h = 0.5 * h * (1.0 + jnp.tanh(_GELU_C * (h + 0.044715 * h ** 3)))
    return jnp.einsum("bth,hc->btc", h, w_proj) + b_proj


if __name__ == "__main__":
    # Small GPT-2-like config: n_embd=64 -> hidden=256, batch=2, seq=8.
    B, T, C = 2, 8, 64
    H = 4 * C

    key = jax.random.PRNGKey(0)
    kx, kwf, kbf, kwp, kbp = jax.random.split(key, 5)

    x = jax.random.normal(kx, (B, T, C), dtype=jnp.float32)
    # nn.Linear-style init (uniform +-1/sqrt(fan_in)); stored as (in, out).
    w_fc = jax.random.uniform(kwf, (C, H), jnp.float32, -1.0, 1.0) / jnp.sqrt(C)
    b_fc = jax.random.uniform(kbf, (H,), jnp.float32, -1.0, 1.0) / jnp.sqrt(C)
    w_proj = jax.random.uniform(kwp, (H, C), jnp.float32, -1.0, 1.0) / jnp.sqrt(H)
    b_proj = jax.random.uniform(kbp, (C,), jnp.float32, -1.0, 1.0) / jnp.sqrt(H)

    ref = mlp_reference(x, w_fc, b_fc, w_proj, b_proj)

    # 1) f32, weights fully resident (fused kernel, no accumulator scratch).
    out = jax.block_until_ready(mlp_pallas(x, w_fc, b_fc, w_proj, b_proj))
    assert out.shape == (B, T, C)
    assert jnp.allclose(out, ref, atol=1e-4, rtol=1e-4)

    # 2) f32, hidden dim streamed as two 128-wide slabs (accumulator path).
    out_acc = jax.block_until_ready(
        mlp_pallas(x, w_fc, b_fc, w_proj, b_proj, th=128))
    assert jnp.allclose(out_acc, ref, atol=1e-4, rtol=1e-4)

    # 3) bf16 operands straight into the MXU (f32 accumulation inside).
    xb = x.astype(jnp.bfloat16)
    wfb, bfb = w_fc.astype(jnp.bfloat16), b_fc.astype(jnp.bfloat16)
    wpb, bpb = w_proj.astype(jnp.bfloat16), b_proj.astype(jnp.bfloat16)
    out_bf = jax.block_until_ready(mlp_pallas(xb, wfb, bfb, wpb, bpb))
    ref_bf = mlp_reference(xb.astype(jnp.float32), wfb.astype(jnp.float32),
                           bfb.astype(jnp.float32), wpb.astype(jnp.float32),
                           bpb.astype(jnp.float32))
    assert jnp.allclose(out_bf.astype(jnp.float32), ref_bf, atol=5e-2, rtol=5e-2)

    print("KERNEL_OK")
</pallas_src>

<mosaic_0001>
module attributes {stable_mosaic.version = 11 : i64} {
  func.func @mlp_kernel_fused(%arg0: i32, %arg1: memref<8x64xf32, #tpu.memory_space<vmem>>, %arg2: memref<64x256xf32, #tpu.memory_space<vmem>>, %arg3: memref<1x256xf32, #tpu.memory_space<vmem>>, %arg4: memref<256x64xf32, #tpu.memory_space<vmem>>, %arg5: memref<1x64xf32, #tpu.memory_space<vmem>>, %arg6: memref<8x64xf32, #tpu.memory_space<vmem>>) attributes {dimension_semantics = [#tpu.dimension_semantics<parallel>], iteration_bounds = array<i64: 2>, scalar_prefetch = 0 : i64, scratch_operands = 0 : i64, tpu.core_type = #tpu.core_type<tc>, window_params = [{transform_indices = @transform_0, window_bounds = array<i64: 8, 64>}, {pipeline_mode = #tpu.pipeline_mode<synchronous>, transform_indices = @transform_1, window_bounds = array<i64: 64, 256>}, {pipeline_mode = #tpu.pipeline_mode<synchronous>, transform_indices = @transform_2, window_bounds = array<i64: 1, 256>}, {pipeline_mode = #tpu.pipeline_mode<synchronous>, transform_indices = @transform_3, window_bounds = array<i64: 256, 64>}, {pipeline_mode = #tpu.pipeline_mode<synchronous>, transform_indices = @transform_4, window_bounds = array<i64: 1, 64>}, {transform_indices = @transform_5, window_bounds = array<i64: 8, 64>}]} {
    %c0 = arith.constant 0 : index
    %c0_0 = arith.constant 0 : index
    %0 = vector.load %arg1[%c0, %c0_0] : memref<8x64xf32, #tpu.memory_space<vmem>>, vector<8x64xf32>
    %c0_1 = arith.constant 0 : index
    %c0_2 = arith.constant 0 : index
    %1 = vector.load %arg2[%c0_1, %c0_2] : memref<64x256xf32, #tpu.memory_space<vmem>>, vector<64x256xf32>
    %cst = arith.constant dense<0.000000e+00> : vector<8x256xf32>
    %2 = tpu.matmul %0, %1, %cst {dimension_numbers = #tpu.dot_dimension_numbers<[1], [0], [0], [1], [0, 0, 1, 1], [], []>} : vector<8x64xf32>, vector<64x256xf32>, vector<8x256xf32> -> vector<8x256xf32>
    %c0_3 = arith.constant 0 : index
    %c0_4 = arith.constant 0 : index
    %3 = vector.load %arg3[%c0_3, %c0_4] : memref<1x256xf32, #tpu.memory_space<vmem>>, vector<1x256xf32>
    %4 = vector.broadcast %3 : vector<1x256xf32> to vector<8x256xf32>
    %5 = arith.addf %2, %4 : vector<8x256xf32>
    %cst_5 = arith.constant 5.000000e-01 : f32
    %6 = vector.broadcast %cst_5 : f32 to vector<8x256xf32>
    %7 = arith.mulf %6, %5 : vector<8x256xf32>
    %cst_6 = arith.constant 4.471500e-02 : f32
    %8 = vector.broadcast %cst_6 : f32 to vector<8x256xf32>
    %9 = arith.mulf %8, %5 : vector<8x256xf32>
    %10 = arith.mulf %9, %5 : vector<8x256xf32>
    %11 = arith.mulf %10, %5 : vector<8x256xf32>
    %12 = arith.addf %5, %11 : vector<8x256xf32>
    %cst_7 = arith.constant 0.797884583 : f32
    %13 = vector.broadcast %cst_7 : f32 to vector<8x256xf32>
    %14 = arith.mulf %13, %12 : vector<8x256xf32>
    %15 = math.tanh %14 : vector<8x256xf32>
    %cst_8 = arith.constant 1.000000e+00 : f32
    %16 = vector.broadcast %cst_8 : f32 to vector<8x256xf32>
    %17 = arith.addf %16, %15 : vector<8x256xf32>
    %18 = arith.mulf %7, %17 : vector<8x256xf32>
    %c0_9 = arith.constant 0 : index
    %c0_10 = arith.constant 0 : index
    %19 = vector.load %arg4[%c0_9, %c0_10] : memref<256x64xf32, #tpu.memory_space<vmem>>, vector<256x64xf32>
    %cst_11 = arith.constant dense<0.000000e+00> : vector<8x64xf32>
    %20 = tpu.matmul %18, %19, %cst_11 {dimension_numbers = #tpu.dot_dimension_numbers<[1], [0], [0], [1], [0, 0, 1, 1], [], []>} : vector<8x256xf32>, vector<256x64xf32>, vector<8x64xf32> -> vector<8x64xf32>
    %c0_12 = arith.constant 0 : index
    %c0_13 = arith.constant 0 : index
    %21 = vector.load %arg5[%c0_12, %c0_13] : memref<1x64xf32, #tpu.memory_space<vmem>>, vector<1x64xf32>
    %22 = vector.broadcast %21 : vector<1x64xf32> to vector<8x64xf32>
    %23 = arith.addf %20, %22 : vector<8x64xf32>
    %c0_14 = arith.constant 0 : index
    %c0_15 = arith.constant 0 : index
    %24 = vector.load %arg6[%c0_14, %c0_15] : memref<8x64xf32, #tpu.memory_space<vmem>>, vector<8x64xf32>
    tpu.vector_store %arg6[%c0_14, %c0_15], %23 {strides = array<i32>} : memref<8x64xf32, #tpu.memory_space<vmem>>, vector<8x64xf32>,
    return
  }
  func.func @transform_0(%arg0: i32) -> (i32, i32) {
    %c0_i32 = arith.constant 0 : i32
    %c0_i32_0 = arith.constant 0 : i32
    return %arg0, %c0_i32 : i32, i32
  }
  func.func @transform_1(%arg0: i32) -> (i32, i32) {
    %c0_i32 = arith.constant 0 : i32
    %c0_i32_0 = arith.constant 0 : i32
    %c0_i32_1 = arith.constant 0 : i32
    return %c0_i32, %c0_i32_0 : i32, i32
  }
  func.func @transform_2(%arg0: i32) -> (i32, i32) {
    %c0_i32 = arith.constant 0 : i32
    %c0_i32_0 = arith.constant 0 : i32
    %c0_i32_1 = arith.constant 0 : i32
    return %c0_i32, %c0_i32_0 : i32, i32
  }
  func.func @transform_3(%arg0: i32) -> (i32, i32) {
    %c0_i32 = arith.constant 0 : i32
    %c0_i32_0 = arith.constant 0 : i32
    %c0_i32_1 = arith.constant 0 : i32
    return %c0_i32, %c0_i32_0 : i32, i32
  }
  func.func @transform_4(%arg0: i32) -> (i32, i32) {
    %c0_i32 = arith.constant 0 : i32
    %c0_i32_0 = arith.constant 0 : i32
    %c0_i32_1 = arith.constant 0 : i32
    return %c0_i32, %c0_i32_0 : i32, i32
  }
  func.func @transform_5(%arg0: i32) -> (i32, i32) {
    %c0_i32 = arith.constant 0 : i32
    %c0_i32_0 = arith.constant 0 : i32
    return %arg0, %c0_i32 : i32, i32
  }
}

module attributes {stable_mosaic.version = 11 : i64} {
  func.func @mlp_kernel_fused(%arg0: i32, %arg1: memref<8x64xf32, #tpu.memory_space<vmem>>, %arg2: memref<64x256xf32, #tpu.memory_space<vmem>>, %arg3: memref<1x256xf32, #tpu.memory_space<vmem>>, %arg4: memref<256x64xf32, #tpu.memory_space<vmem>>, %arg5: memref<1x64xf32, #tpu.memory_space<vmem>>, %arg6: memref<8x64xf32, #tpu.memory_space<vmem>>) attributes {dimension_semantics = [#tpu.dimension_semantics<parallel>], iteration_bounds = array<i64: 2>, scalar_prefetch = 0 : i64, scratch_operands = 0 : i64, tpu.core_type = #tpu.core_type<tc>, window_params = [{transform_indices = @transform_0, window_bounds = array<i64: 8, 64>}, {pipeline_mode = #tpu.pipeline_mode<synchronous>, transform_indices = @transform_1, window_bounds = array<i64: 64, 256>}, {pipeline_mode = #tpu.pipeline_mode<synchronous>, transform_indices = @transform_2, window_bounds = array<i64: 1, 256>}, {pipeline_mode = #tpu.pipeline_mode<synchronous>, transform_indices = @transform_3, window_bounds = array<i64: 256, 64>}, {pipeline_mode = #tpu.pipeline_mode<synchronous>, transform_indices = @transform_4, window_bounds = array<i64: 1, 64>}, {transform_indices = @transform_5, window_bounds = array<i64: 8, 64>}]} {
    %c0 = arith.constant 0 : index
    %c0_0 = arith.constant 0 : index
    %0 = vector.load %arg1[%c0, %c0_0] : memref<8x64xf32, #tpu.memory_space<vmem>>, vector<8x64xf32>
    %c0_1 = arith.constant 0 : index
    %c0_2 = arith.constant 0 : index
    %1 = vector.load %arg2[%c0_1, %c0_2] : memref<64x256xf32, #tpu.memory_space<vmem>>, vector<64x256xf32>
    %cst = arith.constant dense<0.000000e+00> : vector<8x256xf32>
    %2 = tpu.matmul %0, %1, %cst {dimension_numbers = #tpu.dot_dimension_numbers<[1], [0], [0], [1], [0, 0, 1, 1], [], []>} : vector<8x64xf32>, vector<64x256xf32>, vector<8x256xf32> -> vector<8x256xf32>
    %c0_3 = arith.constant 0 : index
    %c0_4 = arith.constant 0 : index
    %3 = vector.load %arg3[%c0_3, %c0_4] : memref<1x256xf32, #tpu.memory_space<vmem>>, vector<1x256xf32>
    %4 = vector.broadcast %3 : vector<1x256xf32> to vector<8x256xf32>
    %5 = arith.addf %2, %4 : vector<8x256xf32>
    %cst_5 = arith.constant 5.000000e-01 : f32
    %6 = vector.broadcast %cst_5 : f32 to vector<8x256xf32>
    %7 = arith.mulf %6, %5 : vector<8x256xf32>
    %cst_6 = arith.constant 4.471500e-02 : f32
    %8 = vector.broadcast %cst_6 : f32 to vector<8x256xf32>
    %9 = arith.mulf %8, %5 : vector<8x256xf32>
    %10 = arith.mulf %9, %5 : vector<8x256xf32>
    %11 = arith.mulf %10, %5 : vector<8x256xf32>
    %12 = arith.addf %5, %11 : vector<8x256xf32>
    %cst_7 = arith.constant 0.797884583 : f32
    %13 = vector.broadcast %cst_7 : f32 to vector<8x256xf32>
    %14 = arith.mulf %13, %12 : vector<8x256xf32>
    %15 = math.tanh %14 : vector<8x256xf32>
    %cst_8 = arith.constant 1.000000e+00 : f32
    %16 = vector.broadcast %cst_8 : f32 to vector<8x256xf32>
    %17 = arith.addf %16, %15 : vector<8x256xf32>
    %18 = arith.mulf %7, %17 : vector<8x256xf32>
    %c0_9 = arith.constant 0 : index
    %c0_10 = arith.constant 0 : index
    %19 = vector.load %arg4[%c0_9, %c0_10] : memref<256x64xf32, #tpu.memory_space<vmem>>, vector<256x64xf32>
    %cst_11 = arith.constant dense<0.000000e+00> : vector<8x64xf32>
    %20 = tpu.matmul %18, %19, %cst_11 {dimension_numbers = #tpu.dot_dimension_numbers<[1], [0], [0], [1], [0, 0, 1, 1], [], []>} : vector<8x256xf32>, vector<256x64xf32>, vector<8x64xf32> -> vector<8x64xf32>
    %c0_12 = arith.constant 0 : index
    %c0_13 = arith.constant 0 : index
    %21 = vector.load %arg5[%c0_12, %c0_13] : memref<1x64xf32, #tpu.memory_space<vmem>>, vector<1x64xf32>
    %22 = vector.broadcast %21 : vector<1x64xf32> to vector<8x64xf32>
    %23 = arith.addf %20, %22 : vector<8x64xf32>
    %c0_14 = arith.constant 0 : index
    %c0_15 = arith.constant 0 : index
    %24 = vector.load %arg6[%c0_14, %c0_15] : memref<8x64xf32, #tpu.memory_space<vmem>>, vector<8x64xf32>
    tpu.vector_store %arg6[%c0_14, %c0_15], %23 {strides = array<i32>} : memref<8x64xf32, #tpu.memory_space<vmem>>, vector<8x64xf32>,
    return
  }
  func.func @transform_0(%arg0: i32) -> (i32, i32) {
    %c0_i32 = arith.constant 0 : i32
    %c0_i32_0 = arith.constant 0 : i32
    return %arg0, %c0_i32 : i32, i32
  }
  func.func @transform_1(%arg0: i32) -> (i32, i32) {
    %c0_i32 = arith.constant 0 : i32
    %c0_i32_0 = arith.constant 0 : i32
    %c0_i32_1 = arith.constant 0 : i32
    return %c0_i32, %c0_i32_0 : i32, i32
  }
  func.func @transform_2(%arg0: i32) -> (i32, i32) {
    %c0_i32 = arith.constant 0 : i32
    %c0_i32_0 = arith.constant 0 : i32
    %c0_i32_1 = arith.constant 0 : i32
    return %c0_i32, %c0_i32_0 : i32, i32
  }
  func.func @transform_3(%arg0: i32) -> (i32, i32) {
    %c0_i32 = arith.constant 0 : i32
    %c0_i32_0 = arith.constant 0 : i32
    %c0_i32_1 = arith.constant 0 : i32
    return %c0_i32, %c0_i32_0 : i32, i32
  }
  func.func @transform_4(%arg0: i32) -> (i32, i32) {
    %c0_i32 = arith.constant 0 : i32
    %c0_i32_0 = arith.constant 0 : i32
    %c0_i32_1 = arith.constant 0 : i32
    return %c0_i32, %c0_i32_0 : i32, i32
  }
  func.func @transform_5(%arg0: i32) -> (i32, i32) {
    %c0_i32 = arith.constant 0 : i32
    %c0_i32_0 = arith.constant 0 : i32
    return %arg0, %c0_i32 : i32, i32
  }
}

</mosaic_0001>

<bundles_post_ra>
// kernel: tpu_custom_call.1
= control target key start
LH: loop header
LB: loop body
LE: loop exit
PB: predicated region body
PF: predicated region fallthrough
CT: control target
= control target key end

     0   :  { %10 = vsyncpa [#allocation3], 0  ;;  %s1012_s0 = inlined_call_operand.vmem [shape: f32[16,64], index: 0, kind: input, shape index: {}]   ;;  %s1013_s1 = inlined_call_operand.vmem [shape: f32[64,256], index: 1, kind: input, shape index: {}]   ;;  %s1014_s2 = inlined_call_operand.vmem [shape: f32[1,256], index: 2, kind: input, shape index: {}]   ;;  %s1015_s3 = inlined_call_operand.vmem [shape: f32[256,64], index: 3, kind: input, shape index: {}]   ;;  %s1016_s4 = inlined_call_operand.vmem [shape: f32[1,64], index: 4, kind: input, shape index: {}]   ;;  %s1017_s5 = inlined_call_operand.hbm [shape: f32[16,64], index: 5, kind: output, shape index: {}]  }
   0x1   :  { %12 = vsyncpa [#allocation3 + $0x1], 0  ;;  %s760_s18 = smov 0   ;;  %s762_s19 = smov 0  }
   0x2   :  { %s764_s20 = smov 0   ;;  %s766_s21 = smov 0  }
   0x3 LB: > { %s781_s22 = sadd.s32 4294967295, %s726_s21   ;;  %s525_s23 = sadd.s32 4294967294, %s726_s21   ;;  %s726_s21 = sphi %s766_s21, %s1023_s21   ;;  %s722_s20 = sphi %s764_s20, %s1022_s20   ;;  %s718_s19 = sphi %s762_s19, %s1021_s19   ;;  %s714_s18 = sphi %s760_s18, %s1020_s18  }
   0x4   : > { %s785_s24 = sadd.s32 1, %s726_s21   ;;  %s135_s25 = sadd.s32 1, %s722_s20 }
   0x5   : > { %s132_s26 = ssub.s32 %s726_s21, %s785_s24  ;;  %p145_p0 = scmp.ne.s32.totalorder %s722_s20, %s718_s19 }
   0x6   : > { %p133_p1 = scmp.eq.s32.totalorder %s132_s26, 0  ;;  %p146_p2 = scmp.eq.s32.totalorder %s781_s22, 1 }
   0x7   : > { %p151_p3 = scmp.ne.s32.totalorder %s718_s19, %s714_s18  ;;  %p152_p4 = scmp.eq.s32.totalorder %s525_s23, 1 }
   0x8   : > { %s796_s27 = scalar_select %p133_p1, %s722_s20, %s135_s25  }
   0x9   : > { %p798_p5 = por %p146_p2, %p145_p0  ;;  %p802_p6 = por %p152_p4, %p151_p3 }
   0xa   : > { %p528_p7 = scmp.ge.s32.totalorder %s726_s21, 1  ;;  %p189_p8 = scmp.lt.s32.totalorder %s726_s21, 3 }
   0xc   : > { %p190_p9 = pnand %p528_p7, %p189_p8 }
   0xd   : > { %v222_v0 = vld [vmem:[%s1013_s1 + $0x8] sm:$0xff] (!%p190_p9)  ;;  %v224_v1 = vld [vmem:[%s1013_s1 + $0x18] sm:$0xff] (!%p190_p9)  ;;  %v221_v2 = vld [vmem:[%s1013_s1] sm:$0xff] (!%p190_p9)  ;;  %v728_v7 = vmov (!%p190_p9), 0.0   ;;  %p216_p10 = scmp.lt.s32.totalorder (!%p190_p9), %s781_s22, 1  ;;  %vm249_vm0 = vcmask (!%p190_p9), 523264  }
   0xe   : > { %193 = sbr.rel (%p190_p9) target bundleno = 504 (0x1f8), region = 40  ;;  %v572_v3 = vpack.c.bf16 (!%p190_p9), %v224_v1, %v222_v0  ;;  %v223_v4 = vld [vmem:[%s1013_s1 + $0x10] sm:$0xff] (!%p190_p9)  ;;  %v226_v5 = vld [vmem:[%s1013_s1 + $0x28] sm:$0xff] (!%p190_p9)  ;;  %v228_v6 = vld [vmem:[%s1013_s1 + $0x38] sm:$0xff] (!%p190_p9)  ;;  %317 = vmatprep.mubr.f32.mxu0 (!%p190_p9), %v728_v7  ;;  %s213_s12 = sand.u32 (!%p190_p9), 1, %s718_s19  }
   0xf   : > { %v574_v8 = vpack.c.bf16 (!%p190_p9), %v223_v4, %v221_v2  ;;  %v576_v9 = vpack.c.bf16 (!%p190_p9), %v228_v6, %v226_v5  ;;  %v225_v10 = vld [vmem:[%s1013_s1 + $0x20] sm:$0xff] (!%p190_p9)  ;;  %v227_v11 = vld [vmem:[%s1013_s1 + $0x30] sm:$0xff] (!%p190_p9)  ;;  %v230_v12 = vld [vmem:[%s1013_s1 + $0x48] sm:$0xff] (!%p190_p9)  ;;  %s529_s13 = sshll.u32 (!%p190_p9), %s213_s12, 3  ;;  %s534_s16 = sshll.u32 (!%p190_p9), %s781_s22, 7 }
  0x10   : > { %573 = vmatprep.subr.bf16.mxu0 (!%p190_p9), %v572_v3  ;;  %v232_v13 = vld [vmem:[%s1013_s1 + $0x58] sm:$0xff] (!%p190_p9)  ;;  %v578_v14 = vpack.c.bf16 (!%p190_p9), %v227_v11, %v225_v10  ;;  %v229_v15 = vld [vmem:[%s1013_s1 + $0x40] sm:$0xff] (!%p190_p9)  ;;  %v231_v16 = vld [vmem:[%s1013_s1 + $0x50] sm:$0xff] (!%p190_p9)  ;;  %v239_v10 = vlaneseq (!%p190_p9)  ;;  %s969_s6 = scalar_lea.hbm (!%p190_p9), %s1017_s5, %s534_s16 }
  0x11   : > { %575 = vmatpush1.bf16.msra.mxu0 (!%p190_p9), %v574_v8  ;;  %v580_v17 = vpack.c.bf16 (!%p190_p9), %v232_v13, %v230_v12  ;;  %v234_v18 = vld [vmem:[%s1013_s1 + $0x68] sm:$0xff] (!%p190_p9)  ;;  %v358_v19 = vld [vmem:[%s1015_s3 + $0x80] sm:$0xff] (!%p190_p9)  ;;  %v236_v21 = vld [vmem:[%s1013_s1 + $0x78] sm:$0xff] (!%p190_p9)  ;;  %v582_v26 = vpack.c.bf16 (!%p190_p9), %v231_v16, %v229_v15 }
  0x12   : > { %577 = vmatprep.subr.bf16.mxu0 (!%p190_p9), %v576_v9  ;;  %v359_v20 = vld [vmem:[%s1015_s3 + $0x88] sm:$0xff] (!%p190_p9)  ;;  %v342_v23 = vld [vmem:[%s1015_s3] sm:$0xff] (!%p190_p9)  ;;  %v584_v27 = vpack.c.bf16 (!%p190_p9), %v236_v21, %v234_v18  ;;  %v235_v29 = vld [vmem:[%s1013_s1 + $0x70] sm:$0xff] (!%p190_p9)  ;;  %v240_v11 = vshrl.u32 (!%p190_p9), %v239_v10, 7 }
  0x13   : > { %v588_v22 = vpack.c.bf16 (!%p190_p9), %v359_v20, %v358_v19  ;;  %v343_v24 = vld [vmem:[%s1015_s3 + $0x8] sm:$0xff] (!%p190_p9)  ;;  %v233_v28 = vld [vmem:[%s1013_s1 + $0x60] sm:$0xff] (!%p190_p9)  ;;  %v360_v32 = vld [vmem:[%s1015_s3 + $0x90] sm:$0xff] (!%p190_p9) }
  0x14   : > { %v590_v25 = vpack.c.bf16 (!%p190_p9), %v343_v24, %v342_v23  ;;  %v586_v30 = vpack.c.bf16 (!%p190_p9), %v235_v29, %v233_v28  ;;  %v361_v33 = vld [vmem:[%s1015_s3 + $0x98] sm:$0xff] (!%p190_p9)  ;;  %v344_v35 = vld [vmem:[%s1015_s3 + $0x10] sm:$0xff] (!%p190_p9)  ;;  %v362_v38 = vld [vmem:[%s1015_s3 + $0xa0] sm:$0xff] (!%p190_p9)  ;;  %v241_v12 = vsub.s32 (!%p190_p9), 0, %v240_v11 }
  0x15   : > { %s217_s30 = scalar_select %p216_p10, %s781_s22, 1  ;;  %579 = vmatpush1.bf16.msra.mxu0 %v578_v14  ;;  %589 = vmatprep.subr.bf16.mxu1 %v588_v22  ;;  %v592_v34 = vpack.c.bf16 %v361_v33, %v360_v32  ;;  %v345_v36 = vld [vmem:[%s1015_s3 + $0x18] sm:$0xff]  ;;  %v363_v39 = vld [vmem:[%s1015_s3 + $0xa8] sm:$0xff]  ;;  %v346_v41 = vld [vmem:[%s1015_s3 + $0x20] sm:$0xff]  ;;  %v245_v14 = vsub.s32 1, %v240_v11 }
  0x16   : > { %581 = vmatprep.subr.bf16.mxu0 %v580_v17  ;;  %591 = vmatpush3.bf16.msra.mxu1 %v590_v25  ;;  %v594_v37 = vpack.c.bf16 %v345_v36, %v344_v35  ;;  %v596_v40 = vpack.c.bf16 %v363_v39, %v362_v38  ;;  %v347_v42 = vld [vmem:[%s1015_s3 + $0x28] sm:$0xff]  ;;  %v364_v44 = vld [vmem:[%s1015_s3 + $0xb0] sm:$0xff]  ;;  %v365_v45 = vld [vmem:[%s1015_s3 + $0xb8] sm:$0xff]  ;;  %s729_s22 = smov [#allocation2]  }
  0x17   : > { %s530_s14 = sshll.u32 %s217_s30, 3  ;;  %593 = vmatprep.subr.bf16.mxu1 %v592_v34  ;;  %v598_v43 = vpack.c.bf16 %v347_v42, %v346_v41  ;;  %v348_v46 = vld [vmem:[%s1015_s3 + $0x30] sm:$0xff]  ;;  %v600_v47 = vpack.c.bf16 %v365_v45, %v364_v44  ;;  %v349_v48 = vld [vmem:[%s1015_s3 + $0x38] sm:$0xff]  ;;  %v366_v49 = vld [vmem:[%s1015_s3 + $0xc0] sm:$0xff]  ;;  %s453_s30 = scalar_lea.sflag [#allocation3], %s213_s12 }
  0x18   : > { %s219_s17 = scalar_lea.vmem %s1012_s0, %s530_s14  ;;  %v367_v50 = vld [vmem:[%s1015_s3 + $0xc8] sm:$0xff]  ;;  %v602_v51 = vpack.c.bf16 %v349_v48, %v348_v46  ;;  %v350_v53 = vld [vmem:[%s1015_s3 + $0x40] sm:$0xff]  ;;  %v368_v55 = vld [vmem:[%s1015_s3 + $0xd0] sm:$0xff]  ;;  %s668_s8 = sshll.u32 %s729_s22, 4  ;;  %s669_s8 = int_to_ptr.vmem [resolvable:$false] %s668_s8 }
  0x19   : > { %583 = vmatpush1.bf16.msra.mxu0 %v582_v26  ;;  %v220_v31 = vld [vmem:[%s219_s17] sm:$0xff]  ;;  %v604_v52 = vpack.c.bf16 %v367_v50, %v366_v49  ;;  %v351_v54 = vld [vmem:[%s1015_s3 + $0x48] sm:$0xff]  ;;  %v369_v56 = vld [vmem:[%s1015_s3 + $0xd8] sm:$0xff]  ;;  %s215_s17 = scalar_lea.vmem [#allocation2], %s529_s13  ;;  %s670_s9 = scalar_lea.vmem %s669_s8, 256 }
  0x1a   : > { %585 = vmatprep.subr.bf16.mxu0 %v584_v27  ;;  %595 = vmatpush3.bf16.msra.mxu1 %v594_v37  ;;  %v606_v57 = vpack.c.bf16 %v351_v54, %v350_v53  ;;  %v608_v58 = vpack.c.bf16 %v369_v56, %v368_v55  ;;  %v352_v59 = vld [vmem:[%s1015_s3 + $0x50] sm:$0xff]  ;;  %v353_v60 = vld [vmem:[%s1015_s3 + $0x58] sm:$0xff]  ;;  %v370_v61 = vld [vmem:[%s1015_s3 + $0xe0] sm:$0xff]  ;;  %s466_s23 = sshll.u32 %s215_s17, 4  ;;  %s971_s23 = int_to_ptr.vmem [resolvable:$true] %s466_s23 }
  0x1b   : > { %597 = vmatprep.subr.bf16.mxu1 %v596_v40  ;;  %v371_v62 = vld [vmem:[%s1015_s3 + $0xe8] sm:$0xff]  ;;  %v610_v63 = vpack.c.bf16 %v353_v60, %v352_v59  ;;  %v354_v1 = vld [vmem:[%s1015_s3 + $0x60] sm:$0xff]  ;;  %v372_v3 = vld [vmem:[%s1015_s3 + $0xf0] sm:$0xff]  ;;  %s664_s7 = scalar_lea.vmem %s971_s23, 128  ;;  %p671_p0 = scmp.lt.s32.totalorder %s971_s23, %s669_s8 }
  0x1c   : > { %v612_v0 = vpack.c.bf16 %v371_v62, %v370_v61  ;;  %v355_v2 = vld [vmem:[%s1015_s3 + $0x68] sm:$0xff]  ;;  %v373_v4 = vld [vmem:[%s1015_s3 + $0xf8] sm:$0xff]  ;;  %v356_v7 = vld [vmem:[%s1015_s3 + $0x70] sm:$0xff]  ;;  %p665_p11 = scmp.ne.s32.totalorder %s971_s23, %s664_s7  ;;  %p672_p1 = scmp.lt.s32.totalorder %s670_s9, %s664_s7 }
  0x1d   : > { %587 = vmatpush1.bf16.msra.mxu0 %v586_v30  ;;  %v614_v5 = vpack.c.bf16 %v355_v2, %v354_v1  ;;  %v616_v6 = vpack.c.bf16 %v373_v4, %v372_v3  ;;  %v357_v8 = vld [vmem:[%s1015_s3 + $0x78] sm:$0xff]  ;;  %v237_v13 = vld [vmem:[%s1014_s2] sm:$0x3] }
  0x1e   : > { %599 = vmatpush3.bf16.msra.mxu1 %v598_v43  ;;  %v618_v9 = vpack.c.bf16 %v357_v8, %v356_v7  ;;  %v242_v15 = vrot.slane %v237_v13, %v241_v12  ;;  %v246_v16 = vrot.slane %v237_v13, %v245_v14  ;;  %v532_v40 = vld [vmem:[%s1016_s4] ss:$0 sm:$0xff]  ;;  %p666_p12 = pnand %p665_p11, %p798_p5  ;;  %p673_p2 = por %p672_p1, %p671_p0 }
  0x1f   : > { %601 = vmatprep.subr.bf16.mxu1 %v600_v47 }
  0x20   : > { %531 = vmatmul.mubr.msk.f32.vlgmr.msra.gmra.mrb[0].mxu0 %vm249_vm0, %v220_v31  ;;  %p667_p13 = pneg %p666_p12 }
  0x22   : > { %603 = vmatpush3.bf16.msra.mxu1 %v602_v51  ;;  %p674_p3 = pnand %p673_p2, %p667_p13 }
  0x23   : > { %605 = vmatprep.subr.bf16.mxu1 %v604_v52 }
  0x26   : > { %607 = vmatpush3.bf16.msra.mxu1 %v606_v57 }
  0x27   : > { %609 = vmatprep.subr.bf16.mxu1 %v608_v58 }
  0x2a   : > { %611 = vmatpush3.bf16.msra.mxu1 %v610_v63 }
  0x2b   : > { %613 = vmatprep.subr.bf16.mxu1 %v612_v0 }
  0x2e   : > { %615 = vmatpush3.bf16.msra.mxu1 %v614_v5 }
  0x2f   : > { %617 = vmatprep.subr.bf16.mxu1 %v616_v6 }
  0x32   : > { %619 = vmatpush3.bf16.msra.mxu1 %v618_v9 }
  0xf3   : > { %v319_v17 = vpop.f32.mrb[0].mxu0 }
  0xf4   : > { %v320_v18 = vadd.f32 %v319_v17, %v242_v15  ;;  %v321_v19 = vpop.f32.mrb[1].mxu0 }
  0xf5   : > { %v322_v20 = vadd.f32 %v321_v19, %v246_v16 }
  0xf6   : > { %v326_v21 = vmul.f32 0.044715, %v320_v18  ;;  %v324_v36 = vmul.f32 0.5, %v320_v18 }
  0xf7   : > { %v327_v22 = vmul.f32 0.044715, %v322_v20  ;;  %v325_v34 = vmul.f32 0.5, %v322_v20 }
  0xf8   : > { %v328_v23 = vmul.f32 %v326_v21, %v320_v18 }
  0xf9   : > { %v329_v24 = vmul.f32 %v327_v22, %v322_v20 }
  0xfa   : > { %v330_v25 = vmul.f32 %v328_v23, %v320_v18 }
  0xfb   : > { %v331_v26 = vmul.f32 %v329_v24, %v322_v20 }
  0xfc   : > { %v332_v27 = vadd.f32 %v330_v25, %v320_v18 }
  0xfd   : > { %v333_v28 = vadd.f32 %v331_v26, %v322_v20 }
  0xfe   : > { %v334_v29 = vmul.f32 0.7978846, %v332_v27 }
  0xff   : > { %v335_v30 = vmul.f32 0.7978846, %v333_v28 }
 0x100   : > { %660 = vtanh.f32 %v334_v29 }
 0x101   : > { %662 = vtanh.f32 %v335_v30 }
 0x10a   : > { %v661_v31 = vpop.eup %660 }
 0x10b   : > { %v663_v32 = vpop.eup %662  ;;  %v338_v33 = vadd.f32 1.0, %v661_v31 }
 0x10c   : > { %v339_v35 = vadd.f32 1.0, %v663_v32 }
 0x10d   : > { %v340_v38 = vmul.f32 %v338_v33, %v324_v36 }
 0x10e   : > { %v341_v37 = vmul.f32 %v339_v35, %v325_v34 }
 0x110   : > { %445 = vmatprep.mubr.f32.mxu1 %v341_v37 }
 0x111   : > { %446 = vmatmul.mubr.f32.vlgmr.msra.gmra.mrb[0].mxu1 %v340_v38 }
 0x1e4   : > { %v569_v39 = vpop.f32.mrb[0].mxu1 }
 0x1e5   : > { %v570_v41 = vpop.f32.mrb[1].mxu1 }
 0x1e6   : > { %v571_v42 = vadd.f32 %v570_v41, %v569_v39 }
 0x1e8   : > { %v448_v43 = vadd.f32 %v571_v42, %v532_v40 }
 0x1ea   : > { %451 = vst.msk [vmem:[%s215_s17] sm:$0xff] %vm249_vm0, %v448_v43 }
 0x1eb   : > { %677 = shalt.err (!%p674_p3)
}
 0x1ec   : > { %s678_s10 = scalar_lea.hbm %s969_s6, 128  ;;  %s682_s13 = scalar_lea.hbm %s1017_s5, 256 }
 0x1ed   : > { %p679_p4 = scmp.ne.s32.totalorder %s969_s6, %s678_s10  ;;  %p683_p9 = scmp.lt.u32.totalorder %s969_s6, %s1017_s5 }
 0x1ee   : > { %p684_p10 = scmp.lt.u32.totalorder %s682_s13, %s678_s10  ;;  %p686_p12 = scmp.lt.u32.totalorder %s678_s10, %s969_s6 }
 0x1ef   : > { %p680_p7 = pnand %p679_p4, %p798_p5 }
 0x1f0   : > { %p685_p11 = por %p684_p10, %p683_p9 }
 0x1f1   : > { %p681_p8 = pneg %p680_p7 }
 0x1f2   : > { %p687_p13 = por %p686_p12, %p685_p11 }
 0x1f4   : > { %p688_p0 = pnand %p687_p13, %p681_p8 }
 0x1f6   : > { %691 = shalt.err (!%p688_p0)
}
 0x1f7   : > { %620 = dma.vmem_to_hbm [thread:$0]  (%p798_p5), %s971_s23, 128, %s969_s6, %s453_s30  }
 0x1f8 PF: > { %p626_p1 = scmp.ge.s32.totalorder %s726_s21, 2  ;;  %s478_s16 = sand.u32 1, %s714_s18  }
 0x1f9   : > { %s479_s17 = scalar_lea.sflag [#allocation3], %s478_s16 }
 0x1fa   : > { %p623_p2 = pnand %p626_p1, %p802_p6 }
 0x1fc   : > { %709 = dma.done.wait (!%p623_p2), %s479_s17, 128  }
 0x1fd   : > { %711 = vsyncadd (!%p623_p2), %s479_s17, 4294967168  ;;  %p15_p3 = scmp.ge.s32.totalorder %s785_s24, 4   ;;  %s1020_s18 = smov %s718_s19 }
 0x1fe   : > { %s1021_s19 = smov %s722_s20  ;;  %s1022_s20 = smov %s796_s27 }
 0x1ff   : > { %s1023_s21 = smov %s785_s24  ;;  %17 = sbr.rel (!%p15_p3) target bundleno = 3 (0x3), region = 75 }
 0x206   :  { %484 = vsyncpa [#allocation3], 1 }
 0x207   :  { %486 = vsyncpa [#allocation3 + $0x1], 1 }

// kernel: tpu_custom_call.1
= control target key start
LH: loop header
LB: loop body
LE: loop exit
PB: predicated region body
PF: predicated region fallthrough
CT: control target
= control target key end

     0   :  { %10 = vsyncpa [#allocation3], 0  ;;  %s1012_s0 = inlined_call_operand.vmem [shape: f32[16,64], index: 0, kind: input, shape index: {}]   ;;  %s1013_s1 = inlined_call_operand.vmem [shape: f32[64,256], index: 1, kind: input, shape index: {}]   ;;  %s1014_s2 = inlined_call_operand.vmem [shape: f32[1,256], index: 2, kind: input, shape index: {}]   ;;  %s1015_s3 = inlined_call_operand.vmem [shape: f32[256,64], index: 3, kind: input, shape index: {}]   ;;  %s1016_s4 = inlined_call_operand.vmem [shape: f32[1,64], index: 4, kind: input, shape index: {}]   ;;  %s1017_s5 = inlined_call_operand.hbm [shape: f32[16,64], index: 5, kind: output, shape index: {}]  }
   0x1   :  { %12 = vsyncpa [#allocation3 + $0x1], 0  ;;  %s760_s18 = smov 0   ;;  %s762_s19 = smov 0  }
   0x2   :  { %s764_s20 = smov 0   ;;  %s766_s21 = smov 0  }
   0x3 LB: > { %s781_s22 = sadd.s32 4294967295, %s726_s21   ;;  %s525_s23 = sadd.s32 4294967294, %s726_s21   ;;  %s726_s21 = sphi %s766_s21, %s1023_s21   ;;  %s722_s20 = sphi %s764_s20, %s1022_s20   ;;  %s718_s19 = sphi %s762_s19, %s1021_s19   ;;  %s714_s18 = sphi %s760_s18, %s1020_s18  }
   0x4   : > { %s785_s24 = sadd.s32 1, %s726_s21   ;;  %s135_s25 = sadd.s32 1, %s722_s20 }
   0x5   : > { %s132_s26 = ssub.s32 %s726_s21, %s785_s24  ;;  %p145_p0 = scmp.ne.s32.totalorder %s722_s20, %s718_s19 }
   0x6   : > { %p133_p1 = scmp.eq.s32.totalorder %s132_s26, 0  ;;  %p146_p2 = scmp.eq.s32.totalorder %s781_s22, 1 }
   0x7   : > { %p151_p3 = scmp.ne.s32.totalorder %s718_s19, %s714_s18  ;;  %p152_p4 = scmp.eq.s32.totalorder %s525_s23, 1 }
   0x8   : > { %s796_s27 = scalar_select %p133_p1, %s722_s20, %s135_s25  }
   0x9   : > { %p798_p5 = por %p146_p2, %p145_p0  ;;  %p802_p6 = por %p152_p4, %p151_p3 }
   0xa   : > { %p528_p7 = scmp.ge.s32.totalorder %s726_s21, 1  ;;  %p189_p8 = scmp.lt.s32.totalorder %s726_s21, 3 }
   0xc   : > { %p190_p9 = pnand %p528_p7, %p189_p8 }
   0xd   : > { %v222_v0 = vld [vmem:[%s1013_s1 + $0x8] sm:$0xff] (!%p190_p9)  ;;  %v224_v1 = vld [vmem:[%s1013_s1 + $0x18] sm:$0xff] (!%p190_p9)  ;;  %v221_v2 = vld [vmem:[%s1013_s1] sm:$0xff] (!%p190_p9)  ;;  %v728_v7 = vmov (!%p190_p9), 0.0   ;;  %p216_p10 = scmp.lt.s32.totalorder (!%p190_p9), %s781_s22, 1  ;;  %vm249_vm0 = vcmask (!%p190_p9), 523264  }
   0xe   : > { %193 = sbr.rel (%p190_p9) target bundleno = 504 (0x1f8), region = 40  ;;  %v572_v3 = vpack.c.bf16 (!%p190_p9), %v224_v1, %v222_v0  ;;  %v223_v4 = vld [vmem:[%s1013_s1 + $0x10] sm:$0xff] (!%p190_p9)  ;;  %v226_v5 = vld [vmem:[%s1013_s1 + $0x28] sm:$0xff] (!%p190_p9)  ;;  %v228_v6 = vld [vmem:[%s1013_s1 + $0x38] sm:$0xff] (!%p190_p9)  ;;  %317 = vmatprep.mubr.f32.mxu0 (!%p190_p9), %v728_v7  ;;  %s213_s12 = sand.u32 (!%p190_p9), 1, %s718_s19  }
   0xf   : > { %v574_v8 = vpack.c.bf16 (!%p190_p9), %v223_v4, %v221_v2  ;;  %v576_v9 = vpack.c.bf16 (!%p190_p9), %v228_v6, %v226_v5  ;;  %v225_v10 = vld [vmem:[%s1013_s1 + $0x20] sm:$0xff] (!%p190_p9)  ;;  %v227_v11 = vld [vmem:[%s1013_s1 + $0x30] sm:$0xff] (!%p190_p9)  ;;  %v230_v12 = vld [vmem:[%s1013_s1 + $0x48] sm:$0xff] (!%p190_p9)  ;;  %s529_s13 = sshll.u32 (!%p190_p9), %s213_s12, 3  ;;  %s534_s16 = sshll.u32 (!%p190_p9), %s781_s22, 7 }
  0x10   : > { %573 = vmatprep.subr.bf16.mxu0 (!%p190_p9), %v572_v3  ;;  %v232_v13 = vld [vmem:[%s1013_s1 + $0x58] sm:$0xff] (!%p190_p9)  ;;  %v578_v14 = vpack.c.bf16 (!%p190_p9), %v227_v11, %v225_v10  ;;  %v229_v15 = vld [vmem:[%s1013_s1 + $0x40] sm:$0xff] (!%p190_p9)  ;;  %v231_v16 = vld [vmem:[%s1013_s1 + $0x50] sm:$0xff] (!%p190_p9)  ;;  %v239_v10 = vlaneseq (!%p190_p9)  ;;  %s969_s6 = scalar_lea.hbm (!%p190_p9), %s1017_s5, %s534_s16 }
  0x11   : > { %575 = vmatpush1.bf16.msra.mxu0 (!%p190_p9), %v574_v8  ;;  %v580_v17 = vpack.c.bf16 (!%p190_p9), %v232_v13, %v230_v12  ;;  %v234_v18 = vld [vmem:[%s1013_s1 + $0x68] sm:$0xff] (!%p190_p9)  ;;  %v358_v19 = vld [vmem:[%s1015_s3 + $0x80] sm:$0xff] (!%p190_p9)  ;;  %v236_v21 = vld [vmem:[%s1013_s1 + $0x78] sm:$0xff] (!%p190_p9)  ;;  %v582_v26 = vpack.c.bf16 (!%p190_p9), %v231_v16, %v229_v15 }
  0x12   : > { %577 = vmatprep.subr.bf16.mxu0 (!%p190_p9), %v576_v9  ;;  %v359_v20 = vld [vmem:[%s1015_s3 + $0x88] sm:$0xff] (!%p190_p9)  ;;  %v342_v23 = vld [vmem:[%s1015_s3] sm:$0xff] (!%p190_p9)  ;;  %v584_v27 = vpack.c.bf16 (!%p190_p9), %v236_v21, %v234_v18  ;;  %v235_v29 = vld [vmem:[%s1013_s1 + $0x70] sm:$0xff] (!%p190_p9)  ;;  %v240_v11 = vshrl.u32 (!%p190_p9), %v239_v10, 7 }
  0x13   : > { %v588_v22 = vpack.c.bf16 (!%p190_p9), %v359_v20, %v358_v19  ;;  %v343_v24 = vld [vmem:[%s1015_s3 + $0x8] sm:$0xff] (!%p190_p9)  ;;  %v233_v28 = vld [vmem:[%s1013_s1 + $0x60] sm:$0xff] (!%p190_p9)  ;;  %v360_v32 = vld [vmem:[%s1015_s3 + $0x90] sm:$0xff] (!%p190_p9) }
  0x14   : > { %v590_v25 = vpack.c.bf16 (!%p190_p9), %v343_v24, %v342_v23  ;;  %v586_v30 = vpack.c.bf16 (!%p190_p9), %v235_v29, %v233_v28  ;;  %v361_v33 = vld [vmem:[%s1015_s3 + $0x98] sm:$0xff] (!%p190_p9)  ;;  %v344_v35 = vld [vmem:[%s1015_s3 + $0x10] sm:$0xff] (!%p190_p9)  ;;  %v362_v38 = vld [vmem:[%s1015_s3 + $0xa0] sm:$0xff] (!%p190_p9)  ;;  %v241_v12 = vsub.s32 (!%p190_p9), 0, %v240_v11 }
  0x15   : > { %s217_s30 = scalar_select %p216_p10, %s781_s22, 1  ;;  %579 = vmatpush1.bf16.msra.mxu0 %v578_v14  ;;  %589 = vmatprep.subr.bf16.mxu1 %v588_v22  ;;  %v592_v34 = vpack.c.bf16 %v361_v33, %v360_v32  ;;  %v345_v36 = vld [vmem:[%s1015_s3 + $0x18] sm:$0xff]  ;;  %v363_v39 = vld [vmem:[%s1015_s3 + $0xa8] sm:$0xff]  ;;  %v346_v41 = vld [vmem:[%s1015_s3 + $0x20] sm:$0xff]  ;;  %v245_v14 = vsub.s32 1, %v240_v11 }
  0x16   : > { %581 = vmatprep.subr.bf16.mxu0 %v580_v17  ;;  %591 = vmatpush3.bf16.msra.mxu1 %v590_v25  ;;  %v594_v37 = vpack.c.bf16 %v345_v36, %v344_v35  ;;  %v596_v40 = vpack.c.bf16 %v363_v39, %v362_v38  ;;  %v347_v42 = vld [vmem:[%s1015_s3 + $0x28] sm:$0xff]  ;;  %v364_v44 = vld [vmem:[%s1015_s3 + $0xb0] sm:$0xff]  ;;  %v365_v45 = vld [vmem:[%s1015_s3 + $0xb8] sm:$0xff]  ;;  %s729_s22 = smov [#allocation2]  }
  0x17   : > { %s530_s14 = sshll.u32 %s217_s30, 3  ;;  %593 = vmatprep.subr.bf16.mxu1 %v592_v34  ;;  %v598_v43 = vpack.c.bf16 %v347_v42, %v346_v41  ;;  %v348_v46 = vld [vmem:[%s1015_s3 + $0x30] sm:$0xff]  ;;  %v600_v47 = vpack.c.bf16 %v365_v45, %v364_v44  ;;  %v349_v48 = vld [vmem:[%s1015_s3 + $0x38] sm:$0xff]  ;;  %v366_v49 = vld [vmem:[%s1015_s3 + $0xc0] sm:$0xff]  ;;  %s453_s30 = scalar_lea.sflag [#allocation3], %s213_s12 }
  0x18   : > { %s219_s17 = scalar_lea.vmem %s1012_s0, %s530_s14  ;;  %v367_v50 = vld [vmem:[%s1015_s3 + $0xc8] sm:$0xff]  ;;  %v602_v51 = vpack.c.bf16 %v349_v48, %v348_v46  ;;  %v350_v53 = vld [vmem:[%s1015_s3 + $0x40] sm:$0xff]  ;;  %v368_v55 = vld [vmem:[%s1015_s3 + $0xd0] sm:$0xff]  ;;  %s668_s8 = sshll.u32 %s729_s22, 4  ;;  %s669_s8 = int_to_ptr.vmem [resolvable:$false] %s668_s8 }
  0x19   : > { %583 = vmatpush1.bf16.msra.mxu0 %v582_v26  ;;  %v220_v31 = vld [vmem:[%s219_s17] sm:$0xff]  ;;  %v604_v52 = vpack.c.bf16 %v367_v50, %v366_v49  ;;  %v351_v54 = vld [vmem:[%s1015_s3 + $0x48] sm:$0xff]  ;;  %v369_v56 = vld [vmem:[%s1015_s3 + $0xd8] sm:$0xff]  ;;  %s215_s17 = scalar_lea.vmem [#allocation2], %s529_s13  ;;  %s670_s9 = scalar_lea.vmem %s669_s8, 256 }
  0x1a   : > { %585 = vmatprep.subr.bf16.mxu0 %v584_v27  ;;  %595 = vmatpush3.bf16.msra.mxu1 %v594_v37  ;;  %v606_v57 = vpack.c.bf16 %v351_v54, %v350_v53  ;;  %v608_v58 = vpack.c.bf16 %v369_v56, %v368_v55  ;;  %v352_v59 = vld [vmem:[%s1015_s3 + $0x50] sm:$0xff]  ;;  %v353_v60 = vld [vmem:[%s1015_s3 + $0x58] sm:$0xff]  ;;  %v370_v61 = vld [vmem:[%s1015_s3 + $0xe0] sm:$0xff]  ;;  %s466_s23 = sshll.u32 %s215_s17, 4  ;;  %s971_s23 = int_to_ptr.vmem [resolvable:$true] %s466_s23 }
  0x1b   : > { %597 = vmatprep.subr.bf16.mxu1 %v596_v40  ;;  %v371_v62 = vld [vmem:[%s1015_s3 + $0xe8] sm:$0xff]  ;;  %v610_v63 = vpack.c.bf16 %v353_v60, %v352_v59  ;;  %v354_v1 = vld [vmem:[%s1015_s3 + $0x60] sm:$0xff]  ;;  %v372_v3 = vld [vmem:[%s1015_s3 + $0xf0] sm:$0xff]  ;;  %s664_s7 = scalar_lea.vmem %s971_s23, 128  ;;  %p671_p0 = scmp.lt.s32.totalorder %s971_s23, %s669_s8 }
  0x1c   : > { %v612_v0 = vpack.c.bf16 %v371_v62, %v370_v61  ;;  %v355_v2 = vld [vmem:[%s1015_s3 + $0x68] sm:$0xff]  ;;  %v373_v4 = vld [vmem:[%s1015_s3 + $0xf8] sm:$0xff]  ;;  %v356_v7 = vld [vmem:[%s1015_s3 + $0x70] sm:$0xff]  ;;  %p665_p11 = scmp.ne.s32.totalorder %s971_s23, %s664_s7  ;;  %p672_p1 = scmp.lt.s32.totalorder %s670_s9, %s664_s7 }
  0x1d   : > { %587 = vmatpush1.bf16.msra.mxu0 %v586_v30  ;;  %v614_v5 = vpack.c.bf16 %v355_v2, %v354_v1  ;;  %v616_v6 = vpack.c.bf16 %v373_v4, %v372_v3  ;;  %v357_v8 = vld [vmem:[%s1015_s3 + $0x78] sm:$0xff]  ;;  %v237_v13 = vld [vmem:[%s1014_s2] sm:$0x3] }
  0x1e   : > { %599 = vmatpush3.bf16.msra.mxu1 %v598_v43  ;;  %v618_v9 = vpack.c.bf16 %v357_v8, %v356_v7  ;;  %v242_v15 = vrot.slane %v237_v13, %v241_v12  ;;  %v246_v16 = vrot.slane %v237_v13, %v245_v14  ;;  %v532_v40 = vld [vmem:[%s1016_s4] ss:$0 sm:$0xff]  ;;  %p666_p12 = pnand %p665_p11, %p798_p5  ;;  %p673_p2 = por %p672_p1, %p671_p0 }
  0x1f   : > { %601 = vmatprep.subr.bf16.mxu1 %v600_v47 }
  0x20   : > { %531 = vmatmul.mubr.msk.f32.vlgmr.msra.gmra.mrb[0].mxu0 %vm249_vm0, %v220_v31  ;;  %p667_p13 = pneg %p666_p12 }
  0x22   : > { %603 = vmatpush3.bf16.msra.mxu1 %v602_v51  ;;  %p674_p3 = pnand %p673_p2, %p667_p13 }
  0x23   : > { %605 = vmatprep.subr.bf16.mxu1 %v604_v52 }
  0x26   : > { %607 = vmatpush3.bf16.msra.mxu1 %v606_v57 }
  0x27   : > { %609 = vmatprep.subr.bf16.mxu1 %v608_v58 }
  0x2a   : > { %611 = vmatpush3.bf16.msra.mxu1 %v610_v63 }
  0x2b   : > { %613 = vmatprep.subr.bf16.mxu1 %v612_v0 }
  0x2e   : > { %615 = vmatpush3.bf16.msra.mxu1 %v614_v5 }
  0x2f   : > { %617 = vmatprep.subr.bf16.mxu1 %v616_v6 }
  0x32   : > { %619 = vmatpush3.bf16.msra.mxu1 %v618_v9 }
  0xf3   : > { %v319_v17 = vpop.f32.mrb[0].mxu0 }
  0xf4   : > { %v320_v18 = vadd.f32 %v319_v17, %v242_v15  ;;  %v321_v19 = vpop.f32.mrb[1].mxu0 }
  0xf5   : > { %v322_v20 = vadd.f32 %v321_v19, %v246_v16 }
  0xf6   : > { %v326_v21 = vmul.f32 0.044715, %v320_v18  ;;  %v324_v36 = vmul.f32 0.5, %v320_v18 }
  0xf7   : > { %v327_v22 = vmul.f32 0.044715, %v322_v20  ;;  %v325_v34 = vmul.f32 0.5, %v322_v20 }
  0xf8   : > { %v328_v23 = vmul.f32 %v326_v21, %v320_v18 }
  0xf9   : > { %v329_v24 = vmul.f32 %v327_v22, %v322_v20 }
  0xfa   : > { %v330_v25 = vmul.f32 %v328_v23, %v320_v18 }
  0xfb   : > { %v331_v26 = vmul.f32 %v329_v24, %v322_v20 }
  0xfc   : > { %v332_v27 = vadd.f32 %v330_v25, %v320_v18 }
  0xfd   : > { %v333_v28 = vadd.f32 %v331_v26, %v322_v20 }
  0xfe   : > { %v334_v29 = vmul.f32 0.7978846, %v332_v27 }
  0xff   : > { %v335_v30 = vmul.f32 0.7978846, %v333_v28 }
 0x100   : > { %660 = vtanh.f32 %v334_v29 }
 0x101   : > { %662 = vtanh.f32 %v335_v30 }
 0x10a   : > { %v661_v31 = vpop.eup %660 }
 0x10b   : > { %v663_v32 = vpop.eup %662  ;;  %v338_v33 = vadd.f32 1.0, %v661_v31 }
 0x10c   : > { %v339_v35 = vadd.f32 1.0, %v663_v32 }
 0x10d   : > { %v340_v38 = vmul.f32 %v338_v33, %v324_v36 }
 0x10e   : > { %v341_v37 = vmul.f32 %v339_v35, %v325_v34 }
 0x110   : > { %445 = vmatprep.mubr.f32.mxu1 %v341_v37 }
 0x111   : > { %446 = vmatmul.mubr.f32.vlgmr.msra.gmra.mrb[0].mxu1 %v340_v38 }
 0x1e4   : > { %v569_v39 = vpop.f32.mrb[0].mxu1 }
 0x1e5   : > { %v570_v41 = vpop.f32.mrb[1].mxu1 }
 0x1e6   : > { %v571_v42 = vadd.f32 %v570_v41, %v569_v39 }
 0x1e8   : > { %v448_v43 = vadd.f32 %v571_v42, %v532_v40 }
 0x1ea   : > { %451 = vst.msk [vmem:[%s215_s17] sm:$0xff] %vm249_vm0, %v448_v43 }
 0x1eb   : > { %677 = shalt.err (!%p674_p3)
}
 0x1ec   : > { %s678_s10 = scalar_lea.hbm %s969_s6, 128  ;;  %s682_s13 = scalar_lea.hbm %s1017_s5, 256 }
 0x1ed   : > { %p679_p4 = scmp.ne.s32.totalorder %s969_s6, %s678_s10  ;;  %p683_p9 = scmp.lt.u32.totalorder %s969_s6, %s1017_s5 }
 0x1ee   : > { %p684_p10 = scmp.lt.u32.totalorder %s682_s13, %s678_s10  ;;  %p686_p12 = scmp.lt.u32.totalorder %s678_s10, %s969_s6 }
 0x1ef   : > { %p680_p7 = pnand %p679_p4, %p798_p5 }
 0x1f0   : > { %p685_p11 = por %p684_p10, %p683_p9 }
 0x1f1   : > { %p681_p8 = pneg %p680_p7 }
 0x1f2   : > { %p687_p13 = por %p686_p12, %p685_p11 }
 0x1f4   : > { %p688_p0 = pnand %p687_p13, %p681_p8 }
 0x1f6   : > { %691 = shalt.err (!%p688_p0)
}
 0x1f7   : > { %620 = dma.vmem_to_hbm [thread:$0]  (%p798_p5), %s971_s23, 128, %s969_s6, %s453_s30  }
 0x1f8 PF: > { %p626_p1 = scmp.ge.s32.totalorder %s726_s21, 2  ;;  %s478_s16 = sand.u32 1, %s714_s18  }
 0x1f9   : > { %s479_s17 = scalar_lea.sflag [#allocation3], %s478_s16 }
 0x1fa   : > { %p623_p2 = pnand %p626_p1, %p802_p6 }
 0x1fc   : > { %709 = dma.done.wait (!%p623_p2), %s479_s17, 128  }
 0x1fd   : > { %711 = vsyncadd (!%p623_p2), %s479_s17, 4294967168  ;;  %p15_p3 = scmp.ge.s32.totalorder %s785_s24, 4   ;;  %s1020_s18 = smov %s718_s19 }
 0x1fe   : > { %s1021_s19 = smov %s722_s20  ;;  %s1022_s20 = smov %s796_s27 }
 0x1ff   : > { %s1023_s21 = smov %s785_s24  ;;  %17 = sbr.rel (!%p15_p3) target bundleno = 3 (0x3), region = 75 }
 0x206   :  { %484 = vsyncpa [#allocation3], 1 }
 0x207   :  { %486 = vsyncpa [#allocation3 + $0x1], 1 }

</bundles_post_ra>
